<compile_context>
chip_gen: v6e
topology: v6e:2x2x1
jax: 0.10.0
libtpu: 0.0.40
codegen_flags: <defaults>
</compile_context>

<pallas_src>
import functools

import jax
import jax.numpy as jnp
from jax.experimental import pallas as pl
from jax.experimental.pallas import tpu as pltpu

F = 5          # in_features == out_features == 5
EPS = 1e-5     # nn.LayerNorm default eps


def fake_model_kernel(x_ref, w_ref, b_ref, o_ref):
    # x_ref: (F, TILE_L)  — features on sublanes, flattened batch*rows on lanes
    # w_ref: (F, F)       — PyTorch nn.Linear layout w[out, in]
    # b_ref: (F, 1)
    x = x_ref[...]
    w = w_ref[...]
    bias = b_ref[...]

    # a[o, :] = sum_i w[o, i] * x[i, :] + bias[o]
    # Unrolled 5-term VPU broadcast-FMA chain; no MXU, no in-kernel transpose.
    a = w[:, 0:1] * x[0:1, :]
    for i in range(1, F):
        a = a + w[:, i : i + 1] * x[i : i + 1, :]
    a = a + bias

    # c = a @ ones(a.shape) is constant across the feature (sublane) axis, so it
    # only shifts the mean:  LayerNorm(a + c) == LayerNorm(a)  (exact identity).
    mean = jnp.mean(a, axis=0, keepdims=True)
    var = jnp.mean((a - mean) ** 2, axis=0, keepdims=True)
    o_ref[...] = (a - mean) * jax.lax.rsqrt(var + EPS)


@functools.partial(jax.jit, static_argnames=("tile_l",))
def fake_model(x, w, b, *, tile_l=65536):
    """x: [B, N, F] float32; w: [F, F] (out, in); b: [F]."""
    B, N, Fd = x.shape
    assert N == F and Fd == F, "torch.matmul(a, ones(a.shape)) requires square last-two dims"

    L = B * N
    # Lane-dense slab: features on sublanes, (batch*rows) on lanes.
    x_t = x.reshape(L, F).T.astype(jnp.float32)                    # (F, L)

    # 128-aligned lane tile (tile_l is rounded to a 128 multiple, so min() stays aligned).
    tile = min(pl.cdiv(tile_l, 128) * 128, pl.cdiv(L, 128) * 128)
    grid = (pl.cdiv(L, tile),)   # ragged last block handled by Pallas edge masking — no pad

    out_t = pl.pallas_call(
        fake_model_kernel,
        out_shape=jax.ShapeDtypeStruct((F, L), jnp.float32),
        grid=grid,
        in_specs=[
            pl.BlockSpec((F, tile), lambda i: (0, i)),   # x slab tile
            pl.BlockSpec((F, F), lambda i: (0, 0)),      # weight, resident
            pl.BlockSpec((F, 1), lambda i: (0, 0)),      # bias, resident
        ],
        out_specs=pl.BlockSpec((F, tile), lambda i: (0, i)),
        compiler_params=pltpu.CompilerParams(
            dimension_semantics=("parallel",),
            # Let XLA fuse the reshape/transpose producer into the x operand's DMA.
            allow_input_fusion=[True, False, False],
            # Headroom for tile sweeps (v5e scoped default is only 16 MiB).
            vmem_limit_bytes=32 * 1024 * 1024,
        ),
    )(x_t, w.astype(jnp.float32), b.reshape(F, 1).astype(jnp.float32))

    # Layout plumbing back to [B, N, F] (required output layout).
    return out_t.T.reshape(B, N, F)


def fake_model_ref(x, w, b):
    """Pure-JAX reference mirroring the original torch math (explicit ones-matmul)."""
    a = jnp.einsum("bnf,of->bno", x, w) + b
    c = jnp.matmul(a, jnp.ones_like(a))
    s = a + c
    mean = jnp.mean(s, axis=-1, keepdims=True)
    var = jnp.mean((s - mean) ** 2, axis=-1, keepdims=True)
    return (s - mean) * jax.lax.rsqrt(var + EPS)


if __name__ == "__main__":
    key = jax.random.PRNGKey(0)
    kx, kw, kb = jax.random.split(key, 3)

    B, N = 2, F
    x = jax.random.normal(kx, (B, N, F), dtype=jnp.float32)

    # Deterministic "Linear(5, 5)" parameters (PyTorch-style uniform(-1/sqrt(5), 1/sqrt(5))).
    bound = 1.0 / jnp.sqrt(jnp.float32(F))
    w = jax.random.uniform(kw, (F, F), minval=-bound, maxval=bound, dtype=jnp.float32)
    b = jax.random.uniform(kb, (F,), minval=-bound, maxval=bound, dtype=jnp.float32)

    out = fake_model(x, w, b)
    jax.block_until_ready(out)

    ref = fake_model_ref(x, w, b)
    assert out.shape == (B, N, F)
    assert jnp.allclose(out, ref, atol=1e-4, rtol=1e-4), "mismatch vs reference"

    print("KERNEL_OK")
</pallas_src>

<mosaic_0001>
module attributes {stable_mosaic.version = 11 : i64} {
  func.func @fake_model_kernel(%arg0: i32, %arg1: memref<5x128xf32, #tpu.memory_space<vmem>>, %arg2: memref<5x5xf32, #tpu.memory_space<vmem>>, %arg3: memref<5x1xf32, #tpu.memory_space<vmem>>, %arg4: memref<5x128xf32, #tpu.memory_space<vmem>>) attributes {dimension_semantics = [#tpu.dimension_semantics<parallel>], iteration_bounds = array<i64: 1>, scalar_prefetch = 0 : i64, scratch_operands = 0 : i64, tpu.core_type = #tpu.core_type<tc>, window_params = [{transform_indices = @transform_0, window_bounds = array<i64: 5, 128>}, {pipeline_mode = #tpu.pipeline_mode<synchronous>, transform_indices = @transform_1, window_bounds = array<i64: 5, 5>}, {pipeline_mode = #tpu.pipeline_mode<synchronous>, transform_indices = @transform_2, window_bounds = array<i64: 5, 1>}, {transform_indices = @transform_3, window_bounds = array<i64: 5, 128>}]} {
    %c0 = arith.constant 0 : index
    %c0_0 = arith.constant 0 : index
    %0 = vector.load %arg1[%c0, %c0_0] : memref<5x128xf32, #tpu.memory_space<vmem>>, vector<5x128xf32>
    %c0_1 = arith.constant 0 : index
    %c0_2 = arith.constant 0 : index
    %1 = vector.load %arg2[%c0_1, %c0_2] : memref<5x5xf32, #tpu.memory_space<vmem>>, vector<5x5xf32>
    %c0_3 = arith.constant 0 : index
    %c0_4 = arith.constant 0 : index
    %2 = vector.load %arg3[%c0_3, %c0_4] : memref<5x1xf32, #tpu.memory_space<vmem>>, vector<5x1xf32>
    %3 = vector.extract_strided_slice %1 {offsets = [0, 0], sizes = [5, 1], strides = [1, 1]} : vector<5x5xf32> to vector<5x1xf32>
    %4 = vector.extract_strided_slice %0 {offsets = [0, 0], sizes = [1, 128], strides = [1, 1]} : vector<5x128xf32> to vector<1x128xf32>
    %5 = vector.broadcast %3 : vector<5x1xf32> to vector<5x128xf32>
    %6 = vector.broadcast %4 : vector<1x128xf32> to vector<5x128xf32>
    %7 = arith.mulf %5, %6 : vector<5x128xf32>
    %8 = vector.extract_strided_slice %1 {offsets = [0, 1], sizes = [5, 1], strides = [1, 1]} : vector<5x5xf32> to vector<5x1xf32>
    %9 = vector.extract_strided_slice %0 {offsets = [1, 0], sizes = [1, 128], strides = [1, 1]} : vector<5x128xf32> to vector<1x128xf32>
    %10 = vector.broadcast %8 : vector<5x1xf32> to vector<5x128xf32>
    %11 = vector.broadcast %9 : vector<1x128xf32> to vector<5x128xf32>
    %12 = arith.mulf %10, %11 : vector<5x128xf32>
    %13 = arith.addf %7, %12 : vector<5x128xf32>
    %14 = vector.extract_strided_slice %1 {offsets = [0, 2], sizes = [5, 1], strides = [1, 1]} : vector<5x5xf32> to vector<5x1xf32>
    %15 = vector.extract_strided_slice %0 {offsets = [2, 0], sizes = [1, 128], strides = [1, 1]} : vector<5x128xf32> to vector<1x128xf32>
    %16 = vector.broadcast %14 : vector<5x1xf32> to vector<5x128xf32>
    %17 = vector.broadcast %15 : vector<1x128xf32> to vector<5x128xf32>
    %18 = arith.mulf %16, %17 : vector<5x128xf32>
    %19 = arith.addf %13, %18 : vector<5x128xf32>
    %20 = vector.extract_strided_slice %1 {offsets = [0, 3], sizes = [5, 1], strides = [1, 1]} : vector<5x5xf32> to vector<5x1xf32>
    %21 = vector.extract_strided_slice %0 {offsets = [3, 0], sizes = [1, 128], strides = [1, 1]} : vector<5x128xf32> to vector<1x128xf32>
    %22 = vector.broadcast %20 : vector<5x1xf32> to vector<5x128xf32>
    %23 = vector.broadcast %21 : vector<1x128xf32> to vector<5x128xf32>
    %24 = arith.mulf %22, %23 : vector<5x128xf32>
    %25 = arith.addf %19, %24 : vector<5x128xf32>
    %26 = vector.extract_strided_slice %1 {offsets = [0, 4], sizes = [5, 1], strides = [1, 1]} : vector<5x5xf32> to vector<5x1xf32>
    %27 = vector.extract_strided_slice %0 {offsets = [4, 0], sizes = [1, 128], strides = [1, 1]} : vector<5x128xf32> to vector<1x128xf32>
    %28 = vector.broadcast %26 : vector<5x1xf32> to vector<5x128xf32>
    %29 = vector.broadcast %27 : vector<1x128xf32> to vector<5x128xf32>
    %30 = arith.mulf %28, %29 : vector<5x128xf32>
    %31 = arith.addf %25, %30 : vector<5x128xf32>
    %32 = vector.broadcast %2 : vector<5x1xf32> to vector<5x128xf32>
    %33 = arith.addf %31, %32 : vector<5x128xf32>
    %cst = arith.constant dense<0.000000e+00> : vector<128xf32>
    %34 = vector.multi_reduction <add>, %33, %cst [0] : vector<5x128xf32> to vector<128xf32>
    %35 = vector.shape_cast %34 : vector<128xf32> to vector<1x128xf32>
    %cst_5 = arith.constant 5.000000e+00 : f32
    %36 = vector.broadcast %cst_5 : f32 to vector<1x128xf32>
    %37 = arith.divf %35, %36 : vector<1x128xf32>
    %38 = vector.broadcast %37 : vector<1x128xf32> to vector<5x128xf32>
    %39 = arith.subf %33, %38 : vector<5x128xf32>
    %40 = arith.mulf %39, %39 : vector<5x128xf32>
    %cst_6 = arith.constant dense<0.000000e+00> : vector<128xf32>
    %41 = vector.multi_reduction <add>, %40, %cst_6 [0] : vector<5x128xf32> to vector<128xf32>
    %42 = vector.shape_cast %41 : vector<128xf32> to vector<1x128xf32>
    %cst_7 = arith.constant 5.000000e+00 : f32
    %43 = vector.broadcast %cst_7 : f32 to vector<1x128xf32>
    %44 = arith.divf %42, %43 : vector<1x128xf32>
    %45 = vector.broadcast %37 : vector<1x128xf32> to vector<5x128xf32>
    %46 = arith.subf %33, %45 : vector<5x128xf32>
    %cst_8 = arith.constant 9.99999974E-6 : f32
    %47 = vector.broadcast %cst_8 : f32 to vector<1x128xf32>
    %48 = arith.addf %44, %47 : vector<1x128xf32>
    %49 = math.rsqrt %48 : vector<1x128xf32>
    %50 = vector.broadcast %49 : vector<1x128xf32> to vector<5x128xf32>
    %51 = arith.mulf %46, %50 : vector<5x128xf32>
    %c0_9 = arith.constant 0 : index
    %c0_10 = arith.constant 0 : index
    %52 = vector.load %arg4[%c0_9, %c0_10] : memref<5x128xf32, #tpu.memory_space<vmem>>, vector<5x128xf32>
    tpu.vector_store %arg4[%c0_9, %c0_10], %51 {strides = array<i32>} : memref<5x128xf32, #tpu.memory_space<vmem>>, vector<5x128xf32>,
    return
  }
  func.func @transform_0(%arg0: i32) -> (i32, i32) {
    %c0_i32 = arith.constant 0 : i32
    %c0_i32_0 = arith.constant 0 : i32
    return %c0_i32, %arg0 : i32, i32
  }
  func.func @transform_1(%arg0: i32) -> (i32, i32) {
    %c0_i32 = arith.constant 0 : i32
    %c0_i32_0 = arith.constant 0 : i32
    %c0_i32_1 = arith.constant 0 : i32
    return %c0_i32, %c0_i32_0 : i32, i32
  }
  func.func @transform_2(%arg0: i32) -> (i32, i32) {
    %c0_i32 = arith.constant 0 : i32
    %c0_i32_0 = arith.constant 0 : i32
    %c0_i32_1 = arith.constant 0 : i32
    return %c0_i32, %c0_i32_0 : i32, i32
  }
  func.func @transform_3(%arg0: i32) -> (i32, i32) {
    %c0_i32 = arith.constant 0 : i32
    %c0_i32_0 = arith.constant 0 : i32
    return %c0_i32, %arg0 : i32, i32
  }
}

</mosaic_0001>

<bundles_post_ra>
// kernel: fake_model.2
= control target key start
LH: loop header
LB: loop body
LE: loop exit
PB: predicated region body
PF: predicated region fallthrough
CT: control target
= control target key end

     0   :  { %v118_v1 = vmov 0   ;;  %v119_v2 = vmov 2   ;;  %v120_v4 = vmov 1   ;;  %v121_v5 = vmov 3   ;;  %s155_s0 = inlined_call_operand.vmem [shape: f32[5,5], index: 0, kind: input, shape index: {}]   ;;  %s156_s1 = inlined_call_operand.vmem [shape: f32[5,1], index: 1, kind: input, shape index: {}]   ;;  %s157_s2 = inlined_call_operand.vmem [shape: f32[10,5], index: 2, kind: input, shape index: {}]   ;;  %s158_s3 = inlined_call_operand.vmem [shape: f32[5,10], index: 3, kind: output, shape index: {}]  }
   0x1   :  { %v19_v0 = vld [vmem:[%s155_s0] sm:$0x1f]  ;;  %110 = vset.pattern.permute.xlu0 %v118_v1  ;;  %112 = vset.pattern.permute.xlu1 %v119_v2  ;;  %v122_v7 = vmov 4   ;;  %v26_v8 = vlaneseq  ;;  %vm77_vm0 = vcmask 1044480  }
   0x2   :  { %v14_v3 = vld [vmem:[%s157_s2] sm:$0x1f]  ;;  %23 = vperm.xlu0 %110, %v19_v0   ;;  %42 = vperm.xlu1 %112, %v19_v0  }
   0x3   :  { %17 = vst [vmem:[#allocation2] sm:$0xff] %v14_v3  ;;  %v20_v6 = vld [vmem:[%s156_s1] sm:$0x1f]  ;;  %v27_v9 = vshrl.u32 %v26_v8, 7 }
   0x5   :  { %v28_v10 = vsub.s32 0, %v27_v9  ;;  %v37_v11 = vsub.s32 1, %v27_v9  ;;  %v47_v14 = vsub.s32 2, %v27_v9  ;;  %v57_v18 = vsub.s32 3, %v27_v9 }
   0x6   :  { %111 = vset.pattern.permute.xlu0 %v120_v4  ;;  %113 = vset.pattern.permute.xlu1 %v121_v5  ;;  %v67_v19 = vsub.s32 4, %v27_v9 }
   0x7   :  { %32 = vperm.xlu0 %111, %v19_v0   ;;  %52 = vperm.xlu1 %113, %v19_v0  }
   0xa   :  { %v18_v12 = vld [vmem:[#allocation2] sm:$0x1f] }
   0xb   :  { %114 = vset.pattern.permute.xlu1 %v122_v7  ;;  %115 = vset.pattern.permute.xlu0 %v118_v1  ;;  %v29_v16 = vrot.slane %v18_v12, %v28_v10  ;;  %v38_v17 = vrot.slane %v18_v12, %v37_v11  ;;  %v48_v20 = vrot.slane %v18_v12, %v47_v14 }
   0xc   :  { %62 = vperm.xlu1 %114, %v19_v0   ;;  %73 = vperm.xlu0 %115, %v20_v6   ;;  %v58_v25 = vrot.slane %v18_v12, %v57_v18  ;;  %v68_v26 = vrot.slane %v18_v12, %v67_v19 }
  0x7d   :  { %v24_v13 = vpop.permute.xlu0 %23  ;;  %v43_v15 = vpop.permute.xlu1 %42 }
  0x7e   :  { %v30_v23 = vmul.f32 %v29_v16, %v24_v13  ;;  %v49_v27 = vmul.f32 %v48_v20, %v43_v15 }
  0x82   :  { %v33_v21 = vpop.permute.xlu0 %32  ;;  %v53_v22 = vpop.permute.xlu1 %52 }
  0x83   :  { %v39_v24 = vmul.f32 %v38_v17, %v33_v21  ;;  %v59_v30 = vmul.f32 %v58_v25, %v53_v22 }
  0x85   :  { %v40_v28 = vadd.f32 %v39_v24, %v30_v23 }
  0x87   :  { %v50_v29 = vadd.f32 %v49_v27, %v40_v28  ;;  %v63_v31 = vpop.permute.xlu1 %62  ;;  %v74_v34 = vpop.permute.xlu0 %73 }
  0x88   :  { %v69_v32 = vmul.f32 %v68_v26, %v63_v31 }
  0x89   :  { %v60_v33 = vadd.f32 %v59_v30, %v50_v29 }
  0x8b   :  { %v70_v35 = vadd.f32 %v69_v32, %v60_v33 }
  0x8d   :  { %v76_v36 = vadd.f32 %v74_v34, %v70_v35 }
  0x8f   :  { %v78_v37 = vsel %vm77_vm0, %v76_v36, 0.0 }
  0x90   :  { %v79_v38 = vrot.slane %v78_v37, 4 }
  0x92   :  { %v80_v39 = vadd.f32 %v79_v38, %v78_v37 }
  0x94   :  { %v81_v40 = vrot.slane %v80_v39, 2 }
  0x96   :  { %v82_v41 = vadd.f32 %v81_v40, %v80_v39 }
  0x98   :  { %v83_v42 = vrot.slane %v82_v41, 1 }
  0x9a   :  { %v84_v43 = vadd.f32 %v83_v42, %v82_v41 }
  0x9c   :  { %v86_v44 = vmul.f32 0.2, %v84_v43 }
  0x9e   :  { %v87_v45 = vsub.f32 %v76_v36, %v86_v44 }
  0xa0   :  { %v88_v46 = vmul.f32 %v87_v45, %v87_v45 }
  0xa2   :  { %v89_v47 = vsel %vm77_vm0, %v88_v46, 0.0 }
  0xa3   :  { %v90_v48 = vrot.slane %v89_v47, 4 }
  0xa5   :  { %v91_v49 = vadd.f32 %v90_v48, %v89_v47 }
  0xa7   :  { %v92_v50 = vrot.slane %v91_v49, 2 }
  0xa9   :  { %v93_v51 = vadd.f32 %v92_v50, %v91_v49 }
  0xab   :  { %v94_v52 = vrot.slane %v93_v51, 1 }
  0xad   :  { %v95_v53 = vadd.f32 %v94_v52, %v93_v51 }
  0xaf   :  { %v96_v54 = vmul.f32 0.2, %v95_v53 }
  0xb1   :  { %v97_v55 = vadd.f32 1e-05, %v96_v54 }
  0xb3   :  { %116 = vrsqrt.f32 %v97_v55 }
  0xc0   :  { %v117_v56 = vpop.eup %116 }
  0xc1   :  { %v99_v57 = vmul.f32 %v117_v56, %v87_v45 }
  0xc3   :  { %100 = vst [vmem:[%s158_s3] sm:$0x1f] %v99_v57 }

</bundles_post_ra>
